<compile_context>
chip_gen: v6e
topology: v6e:2x2x1
jax: 0.10.0
libtpu: 0.0.40
codegen_flags: <defaults>
</compile_context>

<pallas_src>
import functools
from math import pi, sqrt

import numpy as np
import jax
import jax.numpy as jnp
from jax import lax
from jax.experimental import pallas as pl
from jax.experimental.pallas import tpu as pltpu


def _round_up(x, m):
    return ((x + m - 1) // m) * m


# -----------------------------------------------------------------------------
# Pallas kernel: row-weighted partial sums of cos(z @ W + b)  (scale_b folded).
# -----------------------------------------------------------------------------
def _rks_mmd_kernel(z_ref, rw_ref, w_ref, brand_ref, out_ref):
    k = pl.program_id(1)   # batch-tile index (reduction axis)

    @pl.when(k == 0)
    def _():
        out_ref[...] = jnp.zeros_like(out_ref)

    t = z_ref.shape[0]
    fo = w_ref.shape[1]

    # MXU: (t, f_in) @ (f_in, fo) with f32 accumulation; scale_b pre-folded.
    zw = jnp.dot(z_ref[...], w_ref[...], preferred_element_type=jnp.float32)
    phi = jnp.cos(zw + brand_ref[...])           # (t, fo), EUP transcendental
    weighted = phi * rw_ref[...]                 # signed (+1/Na, -1/Nb, 0) rows

    # Collapse only to 8 sublanes per tile (cheap cross-vreg VALU adds); the
    # single cross-sublane reduce + L2 norm run once in the JAX epilogue.
    if t > 8:
        weighted = weighted.reshape(t // 8, 8, fo).sum(axis=0)
    out_ref[...] += weighted


# -----------------------------------------------------------------------------
# Wrapper: label-weighted FastMMD, one static shape per (batch, f_in, mmd_dim).
# -----------------------------------------------------------------------------
def fast_mmd_pallas(z, s, w, b_rand, *, gamma, use_bf16=True, row_tile=128,
                    vmem_limit_bytes=32 * 1024 * 1024):
    """MMD(z[s==1], z[s==0]) via random kitchen sinks, fused in one Pallas kernel."""
    n_rows, f_in = z.shape
    fo = w.shape[1]
    fo_pad = _round_up(fo, 128)
    scale_a = sqrt(2.0 / fo)
    scale_b = sqrt(2.0 / gamma)

    # Signed per-row weights from the protected labels (rows with labels other
    # than 0/1 get weight 0 -- exactly like PyTorch's nonzero() split drops them).
    s_flat = jnp.reshape(s, (n_rows, -1))[:, 0]
    n_a = jnp.sum((s_flat == 1).astype(jnp.float32))
    n_b = jnp.sum((s_flat == 0).astype(jnp.float32))
    row_w = jnp.where(
        s_flat == 1, 1.0 / jnp.maximum(n_a, 1.0),
        jnp.where(s_flat == 0, -1.0 / jnp.maximum(n_b, 1.0), 0.0)
    ).astype(jnp.float32)

    # Batch tiling; split tiles across 2 parallel work units when possible so
    # v7x's two TensorCores stay balanced (harmlessly sequential on v5e/v6e).
    t = max(8, min(_round_up(row_tile, 8), _round_up(n_rows, 8)))
    n_tiles = -(-n_rows // t)
    n_par = 2 if n_tiles >= 2 else 1
    n_tiles = _round_up(n_tiles, n_par)
    tiles_per_par = n_tiles // n_par
    rows_pad = n_tiles * t

    mm_dtype = jnp.bfloat16 if use_bf16 else jnp.float32
    z_p = jnp.pad(z.astype(mm_dtype), ((0, rows_pad - n_rows), (0, 0)))
    rw_p = jnp.pad(row_w, (0, rows_pad - n_rows)).reshape(rows_pad, 1)

    # Fold scale_b into the resident operands once (O(f_in*fo), not per tile).
    # Padded columns stay zero; they are also sliced off before the norm.
    w_p = jnp.zeros((f_in, fo_pad), mm_dtype).at[:, :fo].set(
        (scale_b * w).astype(mm_dtype))
    brand_p = jnp.zeros((1, fo_pad), jnp.float32).at[:, :fo].set(
        (scale_b * b_rand).astype(jnp.float32).reshape(1, fo))

    partials = pl.pallas_call(
        _rks_mmd_kernel,
        out_shape=jax.ShapeDtypeStruct((n_par * 8, fo_pad), jnp.float32),
        grid_spec=pltpu.PrefetchScalarGridSpec(
            num_scalar_prefetch=0,
            grid=(n_par, tiles_per_par),
            in_specs=[
                pl.BlockSpec((t, f_in), lambda p, k: (p * tiles_per_par + k, 0)),
                pl.BlockSpec((t, 1), lambda p, k: (p * tiles_per_par + k, 0)),
                pl.BlockSpec((f_in, fo_pad), lambda p, k: (0, 0)),
                pl.BlockSpec((1, fo_pad), lambda p, k: (0, 0)),
            ],
            out_specs=pl.BlockSpec((8, fo_pad), lambda p, k: (p, 0)),
        ),
        compiler_params=pltpu.CompilerParams(
            dimension_semantics=("parallel", "arbitrary"),
            vmem_limit_bytes=vmem_limit_bytes,
        ),
        cost_estimate=pl.CostEstimate(
            flops=int(2 * rows_pad * f_in * fo_pad + rows_pad * fo_pad),
            transcendentals=int(rows_pad * fo_pad),
            bytes_accessed=int(z_p.size * z_p.dtype.itemsize
                               + rw_p.size * 4
                               + w_p.size * w_p.dtype.itemsize
                               + fo_pad * 4 + n_par * 8 * fo_pad * 4),
        ),
    )(z_p, rw_p, w_p, brand_p)

    diff = jnp.sum(partials, axis=0)[:fo]       # (fo,): mean_a(phi) - mean_b(phi)
    return scale_a * jnp.sqrt(jnp.sum(diff * diff))


def fast_mmd_labels_ref(z, s, w, b_rand, *, gamma):
    """Plain-JAX label-weighted FastMMD (fallback for tiny batches)."""
    fo = w.shape[1]
    scale_a, scale_b = sqrt(2.0 / fo), sqrt(2.0 / gamma)
    s_flat = jnp.reshape(s, (z.shape[0], -1))[:, 0]
    n_a = jnp.sum((s_flat == 1).astype(jnp.float32))
    n_b = jnp.sum((s_flat == 0).astype(jnp.float32))
    row_w = jnp.where(s_flat == 1, 1.0 / jnp.maximum(n_a, 1.0),
                      jnp.where(s_flat == 0, -1.0 / jnp.maximum(n_b, 1.0), 0.0))
    phi = jnp.cos(scale_b * (jnp.dot(z, w, precision=lax.Precision.HIGHEST)
                             + b_rand))
    diff = jnp.sum(row_w[:, None] * phi, axis=0)
    return scale_a * jnp.sqrt(jnp.sum(diff * diff))


def fast_mmd(z, s, w, b_rand, *, gamma, use_bf16=True, force_pallas=False,
             min_pallas_elems=1 << 16):
    """Size-thresholded dispatch: the kernel only pays off above ~a tile of work."""
    if force_pallas or z.shape[0] * w.shape[1] >= min_pallas_elems:
        return fast_mmd_pallas(z, s, w, b_rand, gamma=gamma, use_bf16=use_bf16)
    return fast_mmd_labels_ref(z, s, w, b_rand, gamma=gamma)


# -----------------------------------------------------------------------------
# PyTorch-mirroring references and the remaining VFAE loss terms (plain JAX).
# -----------------------------------------------------------------------------
def fast_mmd_ref(a, b, w, b_rand, *, gamma):
    """Exact mirror of FastMMD.forward (f32, given fixed w/b_rand)."""
    fo = w.shape[1]
    scale_a, scale_b = sqrt(2.0 / fo), sqrt(2.0 / gamma)
    za = jnp.dot(a, w, precision=lax.Precision.HIGHEST)
    zb = jnp.dot(b, w, precision=lax.Precision.HIGHEST)
    phi_a = (scale_a * jnp.cos(scale_b * (za + b_rand))).mean(axis=0)
    phi_b = (scale_a * jnp.cos(scale_b * (zb + b_rand))).mean(axis=0)
    return jnp.linalg.norm(phi_a - phi_b, ord=2)


def _bce_with_logits(logits, targets):
    # torch.nn.BCEWithLogitsLoss (mean reduction), numerically stable form.
    return jnp.mean(jnp.maximum(logits, 0.0) - logits * targets
                    + jnp.log1p(jnp.exp(-jnp.abs(logits))))


def _cross_entropy(logits, labels):
    # torch.nn.CrossEntropyLoss (mean reduction) with integer class labels.
    logp = jax.nn.log_softmax(logits, axis=-1)
    return -jnp.mean(jnp.take_along_axis(logp, labels[:, None], axis=-1))


def _kl_gaussian(logvar_a, mu_a, logvar_b, mu_b):
    per_example = (logvar_b - logvar_a - 1.0
                   + (jnp.exp(logvar_a) + jnp.square(mu_a - mu_b))
                   / jnp.exp(logvar_b))
    return jnp.mean(0.5 * jnp.sum(per_example, axis=1))


def _separate_protected(batch, s):
    # TODO(synk): dynamic-shape (s==1).nonzero() split has no static-shape
    # Pallas equivalent; kept (host round-trip) only for reference checking —
    # the production MMD path uses signed per-row weights instead.
    s_flat = np.asarray(jax.device_get(s)).reshape(s.shape[0], -1)[:, 0]
    idx_protected = np.nonzero(s_flat == 1)[0]
    idx_non_protected = np.nonzero(s_flat == 0)[0]
    return batch[idx_protected], batch[idx_non_protected]


def vfae_loss(y_pred, y_true, w_rand, b_rand, *, alpha=1.0, beta=1.0,
              mmd_gamma=1.0, mmd_from_labels_fn=None):
    x, s, y = y_true['x'], y_true['s'], y_true['y']
    x_s = jnp.concatenate([x, s], axis=-1)
    supervised_loss = _cross_entropy(y_pred['y_decoded'], y)
    reconstruction_loss = _bce_with_logits(y_pred['x_decoded'], x_s)
    kl_loss_z1 = _kl_gaussian(y_pred['z1_enc_logvar'], y_pred['z1_enc_mu'],
                              y_pred['z1_dec_logvar'], y_pred['z1_dec_mu'])
    # Mirrors PyTorch exactly (which requires z1 and z2 latent widths to match
    # for this zeros_like to broadcast).
    zeros = jnp.zeros_like(y_pred['z1_enc_logvar'])
    kl_loss_z2 = _kl_gaussian(y_pred['z2_enc_logvar'], y_pred['z2_enc_mu'],
                              zeros, zeros)
    loss = reconstruction_loss + kl_loss_z1 + kl_loss_z2 + alpha * supervised_loss

    if mmd_from_labels_fn is None:
        mmd_from_labels_fn = fast_mmd
    s_flat = jnp.reshape(s, (s.shape[0], -1))[:, 0]
    n_prot = jnp.sum((s_flat == 1).astype(jnp.float32))
    mmd = mmd_from_labels_fn(y_pred['z1_encoded'], s, w_rand, b_rand,
                             gamma=mmd_gamma)
    # PyTorch only adds the MMD term when the protected subset is non-empty.
    loss = loss + beta * jnp.where(n_prot > 0, mmd, 0.0)
    return loss


if __name__ == "__main__":
    key = jax.random.PRNGKey(0)
    keys = jax.random.split(key, 13)

    # Small shapes consistent with a VFAE forward pass.
    batch, x_dim, s_dim, z1_dim, n_classes = 8, 16, 1, 32, 2
    z2_dim = z1_dim          # PyTorch's zeros_like(z1) in the z2 KL requires this
    mmd_dim, mmd_gamma = 128, 1.0
    alpha, beta = 1.0, 1.0

    # Ground truth.
    x = jax.random.uniform(keys[0], (batch, x_dim), dtype=jnp.float32)
    s = jnp.concatenate([jnp.ones((batch // 2, s_dim), jnp.float32),
                         jnp.zeros((batch - batch // 2, s_dim), jnp.float32)],
                        axis=0)
    y = jax.random.randint(keys[1], (batch,), 0, n_classes)
    y_true = {'x': x, 's': s, 'y': y}

    # VFAE outputs.
    y_pred = {
        'y_decoded': jax.random.normal(keys[2], (batch, n_classes), jnp.float32),
        'x_decoded': jax.random.normal(keys[3], (batch, x_dim + s_dim), jnp.float32),
        'z1_enc_logvar': 0.1 * jax.random.normal(keys[4], (batch, z1_dim), jnp.float32),
        'z1_enc_mu': jax.random.normal(keys[5], (batch, z1_dim), jnp.float32),
        'z1_dec_logvar': 0.1 * jax.random.normal(keys[6], (batch, z1_dim), jnp.float32),
        'z1_dec_mu': jax.random.normal(keys[7], (batch, z1_dim), jnp.float32),
        'z2_enc_logvar': 0.1 * jax.random.normal(keys[8], (batch, z2_dim), jnp.float32),
        'z2_enc_mu': jax.random.normal(keys[9], (batch, z2_dim), jnp.float32),
        'z1_encoded': jax.random.normal(keys[10], (batch, z1_dim), jnp.float32),
    }

    # TODO(synk): FastMMD draws w_rand/b_rand with torch RNG inside forward();
    # here they are drawn once, deterministically, and passed in.
    w_rand = jax.random.normal(keys[11], (z1_dim, mmd_dim), dtype=jnp.float32)
    b_rand = jax.random.uniform(keys[12], (mmd_dim,), dtype=jnp.float32,
                                minval=0.0, maxval=2.0 * pi)

    # --- standalone FastMMD checks vs the PyTorch-mirroring reference --------
    prot, nonprot = _separate_protected(y_pred['z1_encoded'], s)
    ref_f32 = fast_mmd_ref(prot, nonprot, w_rand, b_rand, gamma=mmd_gamma)

    mmd_f32 = jax.block_until_ready(
        fast_mmd_pallas(y_pred['z1_encoded'], s, w_rand, b_rand,
                        gamma=mmd_gamma, use_bf16=False))
    assert jnp.allclose(mmd_f32, ref_f32, rtol=2e-3, atol=2e-3), (mmd_f32, ref_f32)

    mmd_bf16 = jax.block_until_ready(
        fast_mmd_pallas(y_pred['z1_encoded'], s, w_rand, b_rand,
                        gamma=mmd_gamma, use_bf16=True))
    assert jnp.allclose(mmd_bf16, ref_f32, rtol=5e-2, atol=5e-2), (mmd_bf16, ref_f32)

    # Larger, shape-static case: multi-tile accumulation, both parallel work
    # units, and an out_features that needs lane padding (192 -> 256).
    bkeys = jax.random.split(jax.random.PRNGKey(1), 4)
    big_n, big_f, big_fo = 512, 64, 192
    bz = jax.random.normal(bkeys[0], (big_n, big_f), jnp.float32)
    bs = (jax.random.uniform(bkeys[1], (big_n, 1)) < 0.3).astype(jnp.float32)
    bw = jax.random.normal(bkeys[2], (big_f, big_fo), jnp.float32)
    bb = jax.random.uniform(bkeys[3], (big_fo,), minval=0.0, maxval=2.0 * pi)
    prot_b, nonprot_b = _separate_protected(bz, bs)
    ref_big = fast_mmd_ref(prot_b, nonprot_b, bw, bb, gamma=mmd_gamma)
    mmd_big = jax.block_until_ready(
        fast_mmd_pallas(bz, bs, bw, bb, gamma=mmd_gamma, use_bf16=False))
    assert jnp.allclose(mmd_big, ref_big, rtol=2e-3, atol=2e-3), (mmd_big, ref_big)

    # --- full VFAE loss (MMD term on the Pallas kernel, f32 path) ------------
    pallas_f32_mmd = functools.partial(fast_mmd, force_pallas=True, use_bf16=False)
    loss = jax.block_until_ready(
        vfae_loss(y_pred, y_true, w_rand, b_rand, alpha=alpha, beta=beta,
                  mmd_gamma=mmd_gamma, mmd_from_labels_fn=pallas_f32_mmd))

    def mmd_ref_from_labels(z, s_, w, b, *, gamma):
        a_, b_ = _separate_protected(z, s_)
        return fast_mmd_ref(a_, b_, w, b, gamma=gamma)

    loss_ref = vfae_loss(y_pred, y_true, w_rand, b_rand, alpha=alpha, beta=beta,
                         mmd_gamma=mmd_gamma,
                         mmd_from_labels_fn=mmd_ref_from_labels)
    assert jnp.allclose(loss, loss_ref, rtol=2e-3, atol=2e-3), (loss, loss_ref)
    assert bool(jnp.isfinite(loss))

    # Default dispatch path (tiny batch -> plain JAX; big batches -> bf16 kernel)
    # just has to run and be finite.
    loss_default = jax.block_until_ready(
        vfae_loss(y_pred, y_true, w_rand, b_rand, alpha=alpha, beta=beta,
                  mmd_gamma=mmd_gamma))
    assert bool(jnp.isfinite(loss_default))

    print("KERNEL_OK")
</pallas_src>

<mosaic_0001>
module attributes {stable_mosaic.version = 11 : i64} {
  func.func @_rks_mmd_kernel(%arg0: i32, %arg1: i32, %arg2: memref<8x32xf32, #tpu.memory_space<vmem>>, %arg3: memref<8x1xf32, #tpu.memory_space<vmem>>, %arg4: memref<32x128xf32, #tpu.memory_space<vmem>>, %arg5: memref<1x128xf32, #tpu.memory_space<vmem>>, %arg6: memref<8x128xf32, #tpu.memory_space<vmem>>) attributes {dimension_semantics = [#tpu.dimension_semantics<parallel>, #tpu.dimension_semantics<arbitrary>], iteration_bounds = array<i64: 1, 1>, scalar_prefetch = 0 : i64, scratch_operands = 0 : i64, tpu.core_type = #tpu.core_type<tc>, window_params = [{transform_indices = @transform_0, window_bounds = array<i64: 8, 32>}, {transform_indices = @transform_1, window_bounds = array<i64: 8, 1>}, {pipeline_mode = #tpu.pipeline_mode<synchronous>, transform_indices = @transform_2, window_bounds = array<i64: 32, 128>}, {pipeline_mode = #tpu.pipeline_mode<synchronous>, transform_indices = @transform_3, window_bounds = array<i64: 1, 128>}, {transform_indices = @transform_4, window_bounds = array<i64: 8, 128>}]} {
    %c0_i32 = arith.constant 0 : i32
    %0 = arith.cmpi eq, %arg1, %c0_i32 : i32
    %1 = arith.extui %0 : i1 to i32
    %c0_i32_0 = arith.constant 0 : i32
    %2 = arith.cmpi ne, %1, %c0_i32_0 : i32
    scf.if %2 {
      %cst_12 = arith.constant 0.000000e+00 : f32
      %16 = vector.broadcast %cst_12 : f32 to vector<8x128xf32>
      %c0_13 = arith.constant 0 : index
      %c0_14 = arith.constant 0 : index
      %17 = vector.load %arg6[%c0_13, %c0_14] : memref<8x128xf32, #tpu.memory_space<vmem>>, vector<8x128xf32>
      tpu.vector_store %arg6[%c0_13, %c0_14], %16 {strides = array<i32>} : memref<8x128xf32, #tpu.memory_space<vmem>>, vector<8x128xf32>,
    } else {
    }
    %c0 = arith.constant 0 : index
    %c0_1 = arith.constant 0 : index
    %3 = vector.load %arg2[%c0, %c0_1] : memref<8x32xf32, #tpu.memory_space<vmem>>, vector<8x32xf32>
    %c0_2 = arith.constant 0 : index
    %c0_3 = arith.constant 0 : index
    %4 = vector.load %arg4[%c0_2, %c0_3] : memref<32x128xf32, #tpu.memory_space<vmem>>, vector<32x128xf32>
    %cst = arith.constant dense<0.000000e+00> : vector<8x128xf32>
    %5 = tpu.matmul %3, %4, %cst {dimension_numbers = #tpu.dot_dimension_numbers<[1], [0], [0], [1], [0, 0, 1, 1], [], []>} : vector<8x32xf32>, vector<32x128xf32>, vector<8x128xf32> -> vector<8x128xf32>
    %c0_4 = arith.constant 0 : index
    %c0_5 = arith.constant 0 : index
    %6 = vector.load %arg5[%c0_4, %c0_5] : memref<1x128xf32, #tpu.memory_space<vmem>>, vector<1x128xf32>
    %7 = vector.broadcast %6 : vector<1x128xf32> to vector<8x128xf32>
    %8 = arith.addf %5, %7 : vector<8x128xf32>
    %9 = math.cos %8 : vector<8x128xf32>
    %c0_6 = arith.constant 0 : index
    %c0_7 = arith.constant 0 : index
    %10 = vector.load %arg3[%c0_6, %c0_7] : memref<8x1xf32, #tpu.memory_space<vmem>>, vector<8x1xf32>
    %11 = vector.broadcast %10 : vector<8x1xf32> to vector<8x128xf32>
    %12 = arith.mulf %9, %11 : vector<8x128xf32>
    %c0_8 = arith.constant 0 : index
    %c0_9 = arith.constant 0 : index
    %13 = vector.load %arg6[%c0_8, %c0_9] : memref<8x128xf32, #tpu.memory_space<vmem>>, vector<8x128xf32>
    %14 = arith.addf %13, %12 : vector<8x128xf32>
    %c0_10 = arith.constant 0 : index
    %c0_11 = arith.constant 0 : index
    %15 = vector.load %arg6[%c0_10, %c0_11] : memref<8x128xf32, #tpu.memory_space<vmem>>, vector<8x128xf32>
    tpu.vector_store %arg6[%c0_10, %c0_11], %14 {strides = array<i32>} : memref<8x128xf32, #tpu.memory_space<vmem>>, vector<8x128xf32>,
    return
  }
  func.func @transform_0(%arg0: i32, %arg1: i32) -> (i32, i32) {
    %c1_i32 = arith.constant 1 : i32
    %0 = arith.muli %arg0, %c1_i32 : i32
    %1 = arith.addi %0, %arg1 : i32
    %c0_i32 = arith.constant 0 : i32
    %c0_i32_0 = arith.constant 0 : i32
    return %1, %c0_i32 : i32, i32
  }
  func.func @transform_1(%arg0: i32, %arg1: i32) -> (i32, i32) {
    %c1_i32 = arith.constant 1 : i32
    %0 = arith.muli %arg0, %c1_i32 : i32
    %1 = arith.addi %0, %arg1 : i32
    %c0_i32 = arith.constant 0 : i32
    %c0_i32_0 = arith.constant 0 : i32
    return %1, %c0_i32 : i32, i32
  }
  func.func @transform_2(%arg0: i32, %arg1: i32) -> (i32, i32) {
    %c0_i32 = arith.constant 0 : i32
    %c0_i32_0 = arith.constant 0 : i32
    %c0_i32_1 = arith.constant 0 : i32
    return %c0_i32, %c0_i32_0 : i32, i32
  }
  func.func @transform_3(%arg0: i32, %arg1: i32) -> (i32, i32) {
    %c0_i32 = arith.constant 0 : i32
    %c0_i32_0 = arith.constant 0 : i32
    %c0_i32_1 = arith.constant 0 : i32
    return %c0_i32, %c0_i32_0 : i32, i32
  }
  func.func @transform_4(%arg0: i32, %arg1: i32) -> (i32, i32) {
    %c0_i32 = arith.constant 0 : i32
    %c0_i32_0 = arith.constant 0 : i32
    return %arg0, %c0_i32 : i32, i32
  }
}

</mosaic_0001>

<bundles_post_ra>
// kernel: tpu_custom_call.1
= control target key start
LH: loop header
LB: loop body
LE: loop exit
PB: predicated region body
PF: predicated region fallthrough
CT: control target
= control target key end

     0   :  { %9 = vsyncpa [#allocation3], 0  ;;  %s459_s0 = inlined_call_operand.vmem [shape: f32[8,32], index: 0, kind: input, shape index: {}]   ;;  %s460_s1 = inlined_call_operand.vmem [shape: f32[8,1], index: 1, kind: input, shape index: {}]   ;;  %s461_s2 = inlined_call_operand.hbm [shape: f32[32,128], index: 2, kind: input, shape index: {}]   ;;  %s462_s3 = inlined_call_operand.vmem [shape: f32[1,128], index: 3, kind: input, shape index: {}]   ;;  %s463_s4 = inlined_call_operand.hbm [shape: f32[8,128], index: 4, kind: output, shape index: {}]  }
   0x1   :  { %10 = vsyncpa [#allocation4], 0  ;;  %s385_s15 = smov [#allocation2]  }
   0x2   :  { %s32_s16 = sshll.u32 %s385_s15, 4  ;;  %s33_s16 = int_to_ptr.vmem [resolvable:$true] %s32_s16 }
   0x3   :  { %s349_s17 = scalar_lea.vmem %s33_s16, 512  ;;  %p354_p1 = scmp.lt.s32.totalorder %s33_s16, %s33_s16 }
   0x4   :  { %p350_p0 = scmp.ne.s32.totalorder %s33_s16, %s349_s17  ;;  %p355_p2 = scmp.lt.s32.totalorder %s349_s17, %s349_s17 }
   0x6   :  { %p356_p3 = por %p355_p2, %p354_p1 }
   0x8   :  { %p357_p4 = pnand %p356_p3, %p350_p0 }
   0xa   :  { %360 = shalt.err (!%p357_p4)
}
   0xb   :  { %s386_s18 = smov 128   ;;  %s387_s19 = smov 8  }
   0xc   :  { %38 = dma.hbm_to_vmem [thread:$0]  %s461_s2, 512, %s33_s16, [#allocation3], %s386_s18, %s386_s18, %s387_s19  }
   0xd   :  { %381 = dma.done.wait [#allocation3], 512  }
   0xe   :  { %382 = vsyncadd [#allocation3], 4294966784  ;;  %v388_v0 = vmov 0.0   ;;  %vm389_vm0 = vmmov 0   ;;  %v390_v1 = vmov 0   ;;  %v75_v2 = vld [vmem:[#allocation2 + $0x18] sm:$0xff] }
   0xf   :  { %308 = vmatprep.subr.mxu0 %v388_v0  ;;  %316 = vmatprep.mubr.msk.f32.mxu0 %vm389_vm0, %v388_v0  ;;  %v74_v3 = vld [vmem:[#allocation2 + $0x10] sm:$0xff]  ;;  %v260_v4 = vld [vmem:[%s460_s1] sm:$0xff]  ;;  %v73_v5 = vld [vmem:[#allocation2 + $0x8] sm:$0xff]  ;;  %vm83_vm1 = vcmask 261120   ;;  %v391_v23 = vmov 2102212464  }
  0x10   :  { %336 = vset.pattern.permute.xlu0 %v390_v1  ;;  %309 = vmatpush3.msra.mxu0 %v75_v2  ;;  %v72_v6 = vld [vmem:[#allocation2] sm:$0xff]  ;;  %v392_v25 = vmov 920167782   ;;  %v393_v29 = vmov 1326507024  }
  0x11   :  { %310 = vmatprep.subr.mxu0 %v388_v0  ;;  %263 = vperm.xlu0 %336, %v260_v4   ;;  %v71_v7 = vld [vmem:[%s459_s0] sm:$0xff]  ;;  %v394_v31 = vmov 683565275   ;;  %v395_v33 = vmov 2475754826   ;;  %s397_s0 = smov [#allocation5]  }
  0x12   :  { %311 = vmatpush3.msra.mxu0 %v74_v3  ;;  %v297_v8 = vld [vmem:[%s462_s3] ss:$0 sm:$0xff]  ;;  %v396_v36 = vmov 2131351028   ;;  %s276_s1 = sshll.u32 %s397_s0, 4  ;;  %s277_s1 = int_to_ptr.vmem [resolvable:$true] %s276_s1 }
  0x13   :  { %312 = vmatprep.subr.mxu0 %v388_v0  ;;  %s361_s3 = scalar_lea.vmem %s277_s1, 128  ;;  %p366_p6 = scmp.lt.s32.totalorder %s277_s1, %s277_s1 }
  0x14   :  { %313 = vmatpush3.msra.mxu0 %v73_v5  ;;  %p362_p5 = scmp.ne.s32.totalorder %s277_s1, %s361_s3  ;;  %p367_p7 = scmp.lt.s32.totalorder %s361_s3, %s361_s3 }
  0x15   :  { %314 = vmatprep.subr.mxu0 %v388_v0 }
  0x16   :  { %315 = vmatpush3.msra.mxu0 %v72_v6  ;;  %p368_p8 = por %p367_p7, %p366_p6 }
  0x17   :  { %317 = vmatmul.mubr.msk.f32.vlgmr.msra.gmra.mxu0 %vm83_vm1, %v71_v7 }
  0x18   :  { %p369_p9 = pnand %p368_p8, %p362_p5 }
  0xd7   :  { %v153_v9 = vpop.f32.mrf.mxu0 }
  0xd8   :  { %v435_v10 = vadd.f32 %v297_v8, %v153_v9 }
  0xd9   :  { %v318_v11 = vpop.f32.mrf.mxu0 }
  0xda   :  { %v160_v12 = vand.u32 2139095040, %v435_v10  ;;  %v157_v13 = vand.u32 2147483647, %v435_v10  ;;  %vm159_vm9 = vcmp.lt.s32.totalorder %v435_v10, 0  ;;  %vm249_vm14 = vweird.f32 %v435_v10 }
  0xdc   :  { %v161_v14 = vshrl.u32 %v160_v12, 23  ;;  %v164_v16 = vand.u32 8388607, %v157_v13  ;;  %vm158_vm10 = vcmp.le.f32.partialorder %v157_v13, 0.7853982 }
  0xde   :  { %v299_v15 = vadd.s32 4294967169, %v161_v14  ;;  %v165_v19 = vor.u32 8388608, %v164_v16 }
  0xe0   :  { %v167_v17 = vadd.s32 1, %v299_v15  ;;  %v205_v27 = vshll.u32 %v165_v19, 8 }
  0xe2   :  { %vm168_vm2 = vcmp.gt.s32.totalorder %v167_v17, 0 }
  0xe3   :  { %v169_v18 = vsel %vm168_vm2, %v167_v17, 0 }
  0xe4   :  { %v171_v20 = vand.u32 31, %v169_v18  ;;  %v170_v21 = vshrl.u32 %v169_v18, 5 }
  0xe6   :  { %v172_v22 = vsub.s32 32, %v171_v20  ;;  %v183_v24 = vshll.u32 %v391_v23, %v171_v20  ;;  %v186_v26 = vshll.u32 %v392_v25, %v171_v20  ;;  %v174_v32 = vshll.u32 %v394_v31, %v171_v20 }
  0xe7   :  { %v177_v35 = vshll.u32 %v395_v33, %v171_v20  ;;  %v180_v38 = vshll.u32 %v396_v36, %v171_v20  ;;  %vm192_vm3 = vcmp.lt.s32.totalorder %v170_v21, 4  ;;  %vm189_vm4 = vcmp.lt.s32.totalorder %v170_v21, 1 }
  0xe8   :  { %v184_v28 = vshrl.u32 %v392_v25, %v172_v22  ;;  %v187_v30 = vshrl.u32 %v393_v29, %v172_v22  ;;  %v175_v34 = vshrl.u32 %v395_v33, %v172_v22  ;;  %v178_v37 = vshrl.u32 %v396_v36, %v172_v22 }
  0xe9   :  { %v181_v39 = vshrl.u32 %v391_v23, %v172_v22  ;;  %v173_v43 = vshrl.u32 %v394_v31, %v172_v22  ;;  %vm190_vm5 = vcmp.lt.s32.totalorder %v170_v21, 2  ;;  %vm191_vm6 = vcmp.lt.s32.totalorder %v170_v21, 3 }
  0xea   :  { %v185_v40 = vor.u32 %v184_v28, %v183_v24  ;;  %v188_v41 = vor.u32 %v187_v30, %v186_v26  ;;  %v176_v42 = vor.u32 %v175_v34, %v174_v32  ;;  %v179_v44 = vor.u32 %v178_v37, %v177_v35  ;;  %v264_v37 = vpop.permute.xlu0 %263 }
  0xeb   :  { %v182_v45 = vor.u32 %v181_v39, %v180_v38 }
  0xec   :  { %v198_v46 = vsel %vm192_vm3, %v185_v40, 920167782  ;;  %v202_v47 = vsel %vm192_vm3, %v188_v41, 1326507024  ;;  %v197_v49 = vsel %vm189_vm4, %v176_v42, %v179_v44  ;;  %v193_v52 = vsel %vm189_vm4, %v173_v43, %v176_v42 }
  0xed   :  { %v194_v48 = vsel %vm192_vm3, %v182_v45, 2102212464  ;;  %v199_v50 = vsel %vm191_vm6, %v182_v45, %v198_v46  ;;  %v201_v51 = vsel %vm189_vm4, %v179_v44, %v182_v45  ;;  %v203_v55 = vsel %vm191_vm6, %v185_v40, %v202_v47 }
  0xee   :  { %v195_v53 = vsel %vm191_vm6, %v179_v44, %v194_v48  ;;  %v200_v54 = vsel %vm190_vm5, %v197_v49, %v199_v50  ;;  %v204_v56 = vsel %vm190_vm5, %v201_v51, %v203_v55 }
  0xef   :  { %v441_v57 = vmul.u32.u64.low %v205_v27, %v200_v54  ;;  %v442_v58 = vmul.u32.u64.high %v205_v27, %v200_v54, %v441_v57  ;;  %v444_v59 = vmul.u32.u64.low %v205_v27, %v204_v56  ;;  %v445_v60 = vmul.u32.u64.high %v205_v27, %v204_v56, %v444_v59 }
  0xf0   :  { %v196_v61 = vsel %vm190_vm5, %v193_v52, %v195_v53 }
  0xf1   :  { %v215_v62 = vadd.s32 1, %v442_v58  ;;  %v212_v63 = vmul.u32 %v205_v27, %v196_v61  ;;  %vm214_vm7 = vc.u32 %v445_v60, %v441_v57  ;;  %v213_v12 = vadd.s32 %v441_v57, %v445_v60 }
  0xf3   :  { %v216_v0 = vsel %vm214_vm7, %v215_v62, %v442_v58 }
  0xf4   :  { %v217_v1 = vadd.s32 %v216_v0, %v212_v63 }
  0xf6   :  { %v218_v2 = vadd.s32 536870912, %v217_v1 }
  0xf8   :  { %v219_v3 = vshrl.u32 %v218_v2, 30 }
  0xfa   :  { %v220_v4 = vshll.u32 %v219_v3, 30  ;;  %v243_v28 = vsub.s32 4, %v219_v3 }
  0xfc   :  { %v221_v5 = vsub.s32 %v217_v1, %v220_v4  ;;  %v244_v29 = vsel %vm159_vm9, %v243_v28, %v219_v3 }
  0xfd   :  { %v246_v30 = vsel %vm158_vm10, 0, %v244_v29 }
  0xfe   :  { %v223_v6 = vsub.s32 0, %v221_v5  ;;  %v250_v31 = vand.u32 3, %v246_v30 }
 0x100   :  { %v300_v7 = vmin.u32 %v223_v6, %v221_v5  ;;  %vm255_vm11 = vcmp.eq.s32.totalorder %v250_v31, 2  ;;  %vm252_vm12 = vcmp.eq.s32.totalorder %v250_v31, 0  ;;  %vm251_vm13 = vcmp.lt.s32.totalorder %v250_v31, 2 }
 0x102   :  { %v225_v8 = vclz %v300_v7 }
 0x104   :  { %v301_v9 = vadd.s32 4294967294, %v225_v8 }
 0x106   :  { %vm302_vm8 = vcmp.lt.s32.totalorder %v301_v9, 0 }
 0x107   :  { %v228_v11 = vsel %vm302_vm8, 0, %v301_v9 }
 0x108   :  { %v229_v14 = vsub.s32 32, %v228_v11  ;;  %v233_v15 = vsub.s32 4294967266, %v228_v11  ;;  %v230_v16 = vshll.u32 %v221_v5, %v228_v11 }
 0x10a   :  { %v231_v17 = vshrl.u32 %v213_v12, %v229_v14  ;;  %v234_v18 = vadd.s32 127, %v233_v15 }
 0x10c   :  { %v232_v19 = vor.u32 %v231_v17, %v230_v16  ;;  %v235_v20 = vshll.u32 %v234_v18, 23 }
 0x10e   :  { %v236_v21 = vor.u32 4788187, %v235_v20  ;;  %v239_v23 = vcvt.s32.f32 %v232_v19 }
 0x110   :  { %v237_v22 = vand.u32 2147483647, %v236_v21 }
 0x112   :  { %v240_v24 = vmul.f32 %v239_v23, %v237_v22 }
 0x114   :  { %v241_v25 = vxor.u32 2147483648, %v240_v24 }
 0x116   :  { %v242_v26 = vsel %vm159_vm9, %v241_v25, %v240_v24 }
 0x117   :  { %v245_v27 = vsel %vm158_vm10, %v435_v10, %v242_v26 }
 0x118   :  { %337 = vcosq.f32 %v245_v27 }
 0x119   :  { %339 = vsinq.f32 %v245_v27 }
 0x125   :  { %v338_v32 = vpop.eup %337 }
 0x126   :  { %v340_v33 = vpop.eup %339  ;;  %v256_v34 = vxor.u32 2147483648, %v338_v32 }
 0x127   :  { %v253_v35 = vxor.u32 2147483648, %v340_v33 }
 0x128   :  { %v257_v36 = vsel %vm255_vm11, %v256_v34, %v340_v33 }
 0x129   :  { %v254_v38 = vsel %vm252_vm12, %v338_v32, %v253_v35 }
 0x12a   :  { %v258_v13 = vsel %vm251_vm13, %v254_v38, %v257_v36 }
 0x12b   :  { %v259_v39 = vsel %vm249_vm14, nan, %v258_v13 }
 0x12c   :  { %v266_v40 = vmul.f32 %v264_v37, %v259_v39 }
 0x12e   :  { %269 = vst [vmem:[#allocation5] sm:$0xff] %v266_v40 }
 0x12f   :  { %372 = shalt.err (!%p369_p9)
}
 0x130   :  { %279 = dma.vmem_to_hbm [thread:$0]  %s277_s1, 128, %s463_s4, [#allocation4]  }
 0x131   :  { %383 = dma.done.wait [#allocation4], 128  }
 0x132   :  { %384 = vsyncadd [#allocation4], 4294967168 }
 0x133   :  { %283 = vsyncpa [#allocation3], 1 }
 0x134   :  { %284 = vsyncpa [#allocation4], 1 }

</bundles_post_ra>
